<compile_context>
chip_gen: v5e
topology: v5e:2x2
jax: 0.10.0
libtpu: 0.0.40
codegen_flags: <defaults>
</compile_context>

<pallas_src>
import jax
import jax.numpy as jnp
from jax.experimental import pallas as pl
from jax.experimental.pallas import tpu as pltpu

HIDDEN = 128
_X_TILE_TARGET_BYTES = 2 << 20        # ~2 MiB of x per pipeline buffer


def _round_up(n, m):
    return ((n + m - 1) // m) * m


# --------------------------------------------------------------------------- #
# Kernel body
# --------------------------------------------------------------------------- #
def _silu(h, approx):
    # Dropout(p) in eval mode == identity; SiLU = h * sigmoid(h).
    if approx:
        # exp and the approximate reciprocal both run on the EUP slot.
        return h * pl.reciprocal(1.0 + jnp.exp(-h), approx=True)
    return h * jax.nn.sigmoid(h)


def _make_kernel(nk, tk, d_total, approx_silu):
    """Build the kernel body.  nk = number of K (in_features) blocks."""
    mask_k = (nk > 1) and (nk * tk != d_total)

    def _finalize(h, b1_ref, w2_ref, b2_ref, o_ref):
        h = h + b1_ref[...]                                   # (tb, 128) f32
        h = _silu(h, approx_silu)
        # 128 -> 1 projection: VPU multiply + XLU lane reduce (an N=1 MXU matmul
        # would waste 255/256 MXU columns and serialize behind the MXU FIFO).
        out = jnp.sum(h * w2_ref[...], axis=-1) + b2_ref[0, 0]   # (tb,)
        # Lane-dense (1, tb) store: ~one vst per 128 rows instead of one masked
        # vst per 8 rows with a (tb, 1) column layout.
        o_ref[...] = out[None, :].astype(o_ref.dtype)

    if nk == 1:
        def kernel(x_ref, w1_ref, b1_ref, w2_ref, b2_ref, o_ref):
            h = jnp.dot(x_ref[...], w1_ref[...],
                        preferred_element_type=jnp.float32)
            _finalize(h, b1_ref, w2_ref, b2_ref, o_ref)
        return kernel

    def kernel(x_ref, w1_ref, b1_ref, w2_ref, b2_ref, o_ref, acc_ref):
        k = pl.program_id(1)

        @pl.when(k == 0)
        def _():
            acc_ref[...] = jnp.zeros_like(acc_ref)

        xblk = x_ref[...]
        if mask_k:
            # Last K block is ragged: zero the out-of-bounds columns so garbage
            # (possibly NaN/Inf) VMEM contents cannot corrupt the accumulator.
            col = jax.lax.broadcasted_iota(jnp.int32, xblk.shape, 1)
            xblk = jnp.where(k * tk + col < d_total, xblk, jnp.zeros_like(xblk))
        acc_ref[...] += jnp.dot(xblk, w1_ref[...],
                                preferred_element_type=jnp.float32)

        @pl.when(k == nk - 1)
        def _():
            _finalize(acc_ref[...], b1_ref, w2_ref, b2_ref, o_ref)

    return kernel


# --------------------------------------------------------------------------- #
# Tile / VMEM sizing
# --------------------------------------------------------------------------- #
def _vmem_budget(vmem_limit_bytes):
    """Returns (tile-sizing budget, scoped-vmem limit forwarded to the compiler)."""
    if vmem_limit_bytes is not None:
        lim = int(vmem_limit_bytes)
        return max(1 << 20, int(lim * 0.8)), lim
    try:
        cap = int(pltpu.get_tpu_info().vmem_capacity_bytes)
    except Exception:
        cap = 64 << 20                       # v7x-sized fallback; safe on v4+
    limit = min(int(cap * 0.75), 96 << 20)   # v5e/v6e ~96 MiB, v7x ~48 MiB
    budget = min(int(cap * 0.45), 48 << 20)  # headroom for Mosaic internal scratch
    return budget, limit


def _pick_tiles(B, D, x_itemsize, w_itemsize, budget):
    align = max(8, 32 // x_itemsize)         # sublane multiple: 8 f32 / 16 bf16

    def tb_for(bytes_per_row):
        t = _X_TILE_TARGET_BYTES // max(1, bytes_per_row)
        t = max(512, min(8192, t))
        return max(align, (t // align) * align)

    def clamp_to_batch(t):
        if B <= t:
            if B >= 256:
                # keep >= 2 grid steps so v7x's two TensorCores both get work
                t = _round_up(pl.cdiv(B, 2), align)
            else:
                t = _round_up(B, align)
        return max(t, align)

    def ws(tb, tk, nk):                      # rough VMEM working set (bytes)
        return (2 * tb * tk * x_itemsize             # x tile (double buffered)
                + 2 * tk * HIDDEN * w_itemsize       # w1 block (double buffered)
                + 4 * HIDDEN * 4                     # b1 / w2 rows
                + 2 * tb * 4                         # (1, tb) output rows
                + 2 * tb * HIDDEN * 4                # h / silu(h) intermediates
                + (tb * HIDDEN * 4 if nk > 1 else 0))   # accumulator scratch

    def finish(tb, tk, nk):
        if B > tb:
            # multi-tile output: out-block last dim must be a multiple of 128
            tb = _round_up(tb, 128)
        return tb, tk, nk

    # Preferred schedule: whole of w1 resident, single K step.
    tb = clamp_to_batch(tb_for(D * x_itemsize))
    if ws(tb, D, 1) <= budget:
        return finish(tb, D, 1)

    # Large D: stream w1 along a K ("arbitrary") grid axis to bound VMEM.
    tk = 512 if D > 512 else _round_up(D, 128)
    nk = pl.cdiv(D, tk)
    if nk == 1:
        tk = D
    tb = clamp_to_batch(tb_for(tk * x_itemsize))
    while tb > 2 * align and ws(tb, tk, nk) > budget:
        tb = max(align, ((tb // 2) // align) * align)
    return finish(tb, tk, nk)


# --------------------------------------------------------------------------- #
# Wrapper
# --------------------------------------------------------------------------- #
def regress_forward(x, w1, b1, w2_row, b2, *, approx_silu=True,
                    vmem_limit_bytes=None, _force_tk=None):
    """Forward pass of Regress (eval mode).

    x:      (B, D) input (f32 or bf16; pass bf16 end-to-end to halve HBM traffic).
    w1:     (D, 128)  first Linear weight, transposed vs torch.
    b1:     (1, 128)  first Linear bias.
    w2_row: (1, 128)  second Linear weight as a lane-dense row (transposed vs torch).
    b2:     (1, 1)    second Linear bias (lives in SMEM as a scalar).
    Returns (B, 1) in x.dtype.
    """
    B, D = x.shape
    assert w1.shape == (D, HIDDEN), w1.shape
    assert b1.shape == (1, HIDDEN), b1.shape
    assert w2_row.shape == (1, HIDDEN), w2_row.shape
    assert b2.shape == (1, 1), b2.shape
    out_dtype = x.dtype

    budget, vmem_limit = _vmem_budget(vmem_limit_bytes)
    tb, tk, nk = _pick_tiles(B, D, x.dtype.itemsize, w1.dtype.itemsize, budget)
    if _force_tk is not None:               # test-only knob (must be mult of 128)
        tk = int(_force_tk)
        nk = pl.cdiv(D, tk)
    nb = pl.cdiv(B, tb)

    # When K is tiled and ragged, pad w1 (cheap: D*512 bytes) so its blocks divide
    # exactly; the ragged x columns are zero-masked in-kernel.
    if nk > 1 and nk * tk != D:
        w1 = jnp.pad(w1, ((0, nk * tk - D), (0, 0)))

    kernel = _make_kernel(nk, tk, D, approx_silu)
    scratch = [pltpu.VMEM((tb, HIDDEN), jnp.float32)] if nk > 1 else []

    out_rows = pl.pallas_call(
        kernel,
        out_shape=jax.ShapeDtypeStruct((1, nb * tb), out_dtype),
        grid_spec=pltpu.PrefetchScalarGridSpec(
            num_scalar_prefetch=0,
            grid=(nb, nk),                                           # K innermost
            in_specs=[
                pl.BlockSpec((tb, tk), lambda i, k: (i, k)),         # x tile
                pl.BlockSpec((tk, HIDDEN), lambda i, k: (k, 0)),     # w1 block
                pl.BlockSpec((1, HIDDEN), lambda i, k: (0, 0)),      # b1 (resident)
                pl.BlockSpec((1, HIDDEN), lambda i, k: (0, 0)),      # w2 row (resident)
                pl.BlockSpec(memory_space=pltpu.MemorySpace.SMEM),   # b2 scalar
            ],
            out_specs=pl.BlockSpec((1, tb), lambda i, k: (0, i)),    # lane-dense rows
            scratch_shapes=scratch,
        ),
        compiler_params=pltpu.CompilerParams(
            dimension_semantics=("parallel", "arbitrary"),
            vmem_limit_bytes=int(vmem_limit)),
    )(x, w1, b1, w2_row, b2)

    # (1, nb*tb) lane-dense rows -> (B, 1) column; reshape is layout-free and the
    # slice only touches B*4 bytes (vs. a full B*D pad pass before).
    return out_rows.reshape(nb * tb, 1)[:B]


def init_params(key, in_features):
    # Deterministic init mimicking PyTorch Linear's U(-1/sqrt(fan_in), 1/sqrt(fan_in)).
    k1, k2, k3, k4 = jax.random.split(key, 4)
    bound1 = 1.0 / jnp.sqrt(in_features)
    w1 = jax.random.uniform(k1, (in_features, HIDDEN), jnp.float32, -bound1, bound1)
    b1 = jax.random.uniform(k2, (1, HIDDEN), jnp.float32, -bound1, bound1)
    bound2 = 1.0 / jnp.sqrt(HIDDEN)
    w2_row = jax.random.uniform(k3, (1, HIDDEN), jnp.float32, -bound2, bound2)
    b2 = jax.random.uniform(k4, (1, 1), jnp.float32, -bound2, bound2)
    return w1, b1, w2_row, b2


if __name__ == "__main__":
    key = jax.random.PRNGKey(0)
    kx, kp, kx2 = jax.random.split(key, 3)

    # ---- small model: in_features = 32 -------------------------------------
    D = 32
    w1, b1, w2_row, b2 = init_params(kp, D)

    def reference(xv):
        h = xv @ w1 + b1
        h = h * jax.nn.sigmoid(h)
        return h @ w2_row.T + b2

    x16 = jax.random.normal(kx, (16, D), jnp.float32)

    # (1) exact-SiLU path, tiny aligned batch
    o = jax.block_until_ready(regress_forward(x16, w1, b1, w2_row, b2,
                                              approx_silu=False))
    assert o.shape == (16, 1), o.shape
    assert jnp.allclose(o, reference(x16), atol=1e-4, rtol=1e-4), "f32 mismatch"

    # (2) ragged batch (13 rows) -> exercises the no-pad ragged last block
    o = jax.block_until_ready(regress_forward(x16[:13], w1, b1, w2_row, b2,
                                              approx_silu=False))
    assert o.shape == (13, 1), o.shape
    assert jnp.allclose(o, reference(x16[:13]), atol=1e-4, rtol=1e-4), "ragged mismatch"

    # (3) mid batch (300 rows) -> >= 2 grid steps (v7x split) + multi-tile lane-dense out
    x300 = jax.random.normal(kx2, (300, D), jnp.float32)
    o = jax.block_until_ready(regress_forward(x300, w1, b1, w2_row, b2,
                                              approx_silu=False))
    assert o.shape == (300, 1), o.shape
    assert jnp.allclose(o, reference(x300), atol=1e-4, rtol=1e-4), "multi-tile mismatch"

    # (4) default approx-SiLU path (EUP reciprocal), loose tolerance
    o = jax.block_until_ready(regress_forward(x16, w1, b1, w2_row, b2))
    assert jnp.allclose(o, reference(x16), atol=2e-2, rtol=2e-2), "approx-silu mismatch"

    # (5) bf16 end-to-end (producer supplies bf16 x / w1; no wrapper cast)
    o = jax.block_until_ready(
        regress_forward(x16.astype(jnp.bfloat16), w1.astype(jnp.bfloat16),
                        b1, w2_row, b2, approx_silu=False))
    assert o.shape == (16, 1), o.shape
    assert jnp.allclose(o.astype(jnp.float32), reference(x16),
                        atol=5e-2, rtol=5e-2), "bf16 mismatch"

    # ---- K-tiled path (streamed w1 + f32 accumulator), forced small tk -----
    D2 = 640
    w1b, b1b, w2b, b2b = init_params(jax.random.fold_in(kp, 1), D2)
    xk = jax.random.normal(jax.random.fold_in(kx, 1), (64, D2), jnp.float32)
    hk = xk @ w1b + b1b
    refk = (hk * jax.nn.sigmoid(hk)) @ w2b.T + b2b
    o = jax.block_until_ready(regress_forward(xk, w1b, b1b, w2b, b2b,
                                              approx_silu=False, _force_tk=256))
    assert o.shape == (64, 1), o.shape
    assert jnp.allclose(o, refk, atol=2e-2, rtol=2e-2), "k-tiled mismatch"

    print("KERNEL_OK")
</pallas_src>

<mosaic_0001>
module attributes {stable_mosaic.version = 11 : i64} {
  func.func @kernel(%arg0: i32, %arg1: i32, %arg2: memref<16x32xf32, #tpu.memory_space<vmem>>, %arg3: memref<32x128xf32, #tpu.memory_space<vmem>>, %arg4: memref<1x128xf32, #tpu.memory_space<vmem>>, %arg5: memref<1x128xf32, #tpu.memory_space<vmem>>, %arg6: memref<1x1xf32, #tpu.memory_space<smem>>, %arg7: memref<1x16xf32, #tpu.memory_space<vmem>>) attributes {dimension_semantics = [#tpu.dimension_semantics<parallel>, #tpu.dimension_semantics<arbitrary>], iteration_bounds = array<i64: 1, 1>, scalar_prefetch = 0 : i64, scratch_operands = 0 : i64, tpu.core_type = #tpu.core_type<tc>, window_params = [{transform_indices = @transform_0, window_bounds = array<i64: 16, 32>}, {transform_indices = @transform_1, window_bounds = array<i64: 32, 128>}, {pipeline_mode = #tpu.pipeline_mode<synchronous>, transform_indices = @transform_2, window_bounds = array<i64: 1, 128>}, {pipeline_mode = #tpu.pipeline_mode<synchronous>, transform_indices = @transform_3, window_bounds = array<i64: 1, 128>}, {transform_indices = @transform_4, window_bounds = array<i64: 1, 1>}, {transform_indices = @transform_5, window_bounds = array<i64: 1, 16>}]} {
    %c0 = arith.constant 0 : index
    %c0_0 = arith.constant 0 : index
    %0 = vector.load %arg2[%c0, %c0_0] : memref<16x32xf32, #tpu.memory_space<vmem>>, vector<16x32xf32>
    %c0_1 = arith.constant 0 : index
    %c0_2 = arith.constant 0 : index
    %1 = vector.load %arg3[%c0_1, %c0_2] : memref<32x128xf32, #tpu.memory_space<vmem>>, vector<32x128xf32>
    %cst = arith.constant dense<0.000000e+00> : vector<16x128xf32>
    %2 = tpu.matmul %0, %1, %cst {dimension_numbers = #tpu.dot_dimension_numbers<[1], [0], [0], [1], [0, 0, 1, 1], [], []>} : vector<16x32xf32>, vector<32x128xf32>, vector<16x128xf32> -> vector<16x128xf32>
    %c0_3 = arith.constant 0 : index
    %c0_4 = arith.constant 0 : index
    %3 = vector.load %arg4[%c0_3, %c0_4] : memref<1x128xf32, #tpu.memory_space<vmem>>, vector<1x128xf32>
    %4 = vector.broadcast %3 : vector<1x128xf32> to vector<16x128xf32>
    %5 = arith.addf %2, %4 : vector<16x128xf32>
    %6 = arith.negf %5 : vector<16x128xf32>
    %7 = math.exp %6 : vector<16x128xf32>
    %cst_5 = arith.constant 1.000000e+00 : f32
    %8 = vector.broadcast %cst_5 : f32 to vector<16x128xf32>
    %9 = arith.addf %8, %7 : vector<16x128xf32>
    %10 = arith.divf %8, %9 : vector<16x128xf32>
    %11 = arith.mulf %5, %10 : vector<16x128xf32>
    %c0_6 = arith.constant 0 : index
    %c0_7 = arith.constant 0 : index
    %12 = vector.load %arg5[%c0_6, %c0_7] : memref<1x128xf32, #tpu.memory_space<vmem>>, vector<1x128xf32>
    %13 = vector.broadcast %12 : vector<1x128xf32> to vector<16x128xf32>
    %14 = arith.mulf %11, %13 : vector<16x128xf32>
    %cst_8 = arith.constant dense<0.000000e+00> : vector<16xf32>
    %15 = vector.multi_reduction <add>, %14, %cst_8 [1] : vector<16x128xf32> to vector<16xf32>
    %c0_9 = arith.constant 0 : index
    %c0_10 = arith.constant 0 : index
    %16 = memref.load %arg6[%c0_9, %c0_10] : memref<1x1xf32, #tpu.memory_space<smem>>
    %17 = vector.broadcast %16 : f32 to vector<16xf32>
    %18 = arith.addf %15, %17 : vector<16xf32>
    %19 = vector.shape_cast %18 : vector<16xf32> to vector<1x16xf32>
    %c0_11 = arith.constant 0 : index
    %c0_12 = arith.constant 0 : index
    %20 = vector.load %arg7[%c0_11, %c0_12] : memref<1x16xf32, #tpu.memory_space<vmem>>, vector<1x16xf32>
    tpu.vector_store %arg7[%c0_11, %c0_12], %19 {strides = array<i32>} : memref<1x16xf32, #tpu.memory_space<vmem>>, vector<1x16xf32>,
    return
  }
  func.func @transform_0(%arg0: i32, %arg1: i32) -> (i32, i32) {
    %c0_i32 = arith.constant 0 : i32
    return %arg0, %arg1 : i32, i32
  }
  func.func @transform_1(%arg0: i32, %arg1: i32) -> (i32, i32) {
    %c0_i32 = arith.constant 0 : i32
    %c0_i32_0 = arith.constant 0 : i32
    return %arg1, %c0_i32 : i32, i32
  }
  func.func @transform_2(%arg0: i32, %arg1: i32) -> (i32, i32) {
    %c0_i32 = arith.constant 0 : i32
    %c0_i32_0 = arith.constant 0 : i32
    %c0_i32_1 = arith.constant 0 : i32
    return %c0_i32, %c0_i32_0 : i32, i32
  }
  func.func @transform_3(%arg0: i32, %arg1: i32) -> (i32, i32) {
    %c0_i32 = arith.constant 0 : i32
    %c0_i32_0 = arith.constant 0 : i32
    %c0_i32_1 = arith.constant 0 : i32
    return %c0_i32, %c0_i32_0 : i32, i32
  }
  func.func @transform_4(%arg0: i32, %arg1: i32) -> (i32, i32) {
    %c0_i32 = arith.constant 0 : i32
    %c0_i32_0 = arith.constant 0 : i32
    %c0_i32_1 = arith.constant 0 : i32
    return %c0_i32, %c0_i32_0 : i32, i32
  }
  func.func @transform_5(%arg0: i32, %arg1: i32) -> (i32, i32) {
    %c0_i32 = arith.constant 0 : i32
    %c0_i32_0 = arith.constant 0 : i32
    return %c0_i32, %arg0 : i32, i32
  }
}

</mosaic_0001>

<bundles_post_ra>
// kernel: tpu_custom_call.1
= control target key start
LH: loop header
LB: loop body
LE: loop exit
PB: predicated region body
PF: predicated region fallthrough
CT: control target
= control target key end

     0   :  { %11 = vsyncpa [#allocation4], 0  ;;  %s332_s0 = inlined_call_operand.hbm [shape: f32[16,32], index: 0, kind: input, shape index: {}]   ;;  %s333_s1 = inlined_call_operand.hbm [shape: f32[32,128], index: 1, kind: input, shape index: {}]   ;;  %s334_s2 = inlined_call_operand.vmem [shape: f32[1,128], index: 2, kind: input, shape index: {}]   ;;  %s335_s3 = inlined_call_operand.vmem [shape: f32[1,128], index: 3, kind: input, shape index: {}]   ;;  %s336_s4 = inlined_call_operand.<no memory space> [shape: f32[1,1], index: 4, kind: input, shape index: {}]   ;;  %s337_s5 = inlined_call_operand.hbm [shape: f32[1,16], index: 5, kind: output, shape index: {}]  }
   0x1   :  { %12 = vsyncpa [#allocation7], 0 }
   0x2   :  { %13 = vsyncpa [#allocation5], 0  ;;  %s18_s20 = sshll.u32 %s332_s0, 4  ;;  %s279_s21 = smov [#allocation3]   ;;  %s19_s20 = int_to_ptr.hbm [resolvable:$true] %s18_s20 }
   0x3   :  { %s20_s22 = sshll.u32 %s279_s21, 4  ;;  %s31_s25 = sshll.u32 %s333_s1, 4  ;;  %s21_s22 = int_to_ptr.vmem [resolvable:$true] %s20_s22  ;;  %s32_s25 = int_to_ptr.hbm [resolvable:$true] %s31_s25 }
   0x4   :  { %s280_s26 = smov 128   ;;  %s281_s27 = smov 8  }
   0x5   :  { %26 = dma.hbm_to_vmem [thread:$0]  %s19_s20, 256, %s21_s22, [#allocation4], %s280_s26, %s280_s26, %s281_s27  }
   0x6   :  { %s282_s28 = smov [#allocation6]  }
   0x7   :  { %s33_s29 = sshll.u32 %s282_s28, 4  ;;  %s34_s29 = int_to_ptr.vmem [resolvable:$true] %s33_s29 }
   0x8   :  { %39 = dma.hbm_to_vmem [thread:$0]  %s32_s25, 512, %s34_s29, [#allocation7], %s280_s26, %s280_s26, %s281_s27  }
   0x9   :  { %273 = dma.done.wait [#allocation4], 256  }
   0xa   :  { %274 = vsyncadd [#allocation4], 4294967040 }
   0xb   :  { %275 = dma.done.wait [#allocation7], 512  }
   0xc   :  { %276 = vsyncadd [#allocation7], 4294966784  ;;  %v59_v0 = vld [vmem:[#allocation6 + $0x18] sm:$0xff]  ;;  %v58_v1 = vld [vmem:[#allocation6 + $0x10] sm:$0xff]  ;;  %vm64_vm0 = vcmask 261120   ;;  %v150_v43 = vlaneseq  ;;  %v145_v44 = vstv %s336_s4  ;;  %s167_s11 = sshll.u32 %s337_s5, 4  ;;  %s168_s11 = int_to_ptr.hbm [resolvable:$true] %s167_s11 }
   0xd   :  { %83 = vmatpush.msra.mxu0 %v59_v0  ;;  %182 = vmatpush.msra.mxu1 %v59_v0  ;;  %v57_v2 = vld [vmem:[#allocation6 + $0x8] sm:$0xff]  ;;  %v56_v3 = vld [vmem:[#allocation6] sm:$0xff]  ;;  %v54_v4 = vld [vmem:[#allocation3] sm:$0xff]  ;;  %vm155_vm9 = vcmask 130112   ;;  %vm158_vm10 = vcmask 122880  }
   0xe   :  { %v55_v5 = vld [vmem:[#allocation3 + $0x8] sm:$0xff]  ;;  %v191_v6 = vld [vmem:[%s334_s2] ss:$0 sm:$0xff]  ;;  %v151_v45 = vand.u32 127, %v150_v43 }
   0xf   :  { %84 = vmatpush.msra.mxu0 %v58_v1  ;;  %183 = vmatpush.msra.mxu1 %v58_v1  ;;  %v192_v33 = vld [vmem:[%s335_s3] ss:$0 sm:$0xff]  ;;  %s283_s3 = smov [#allocation8]  }
  0x10   :  { %v153_v47 = vadd.s32 4294967288, %v151_v45  ;;  %s165_s8 = sshll.u32 %s283_s3, 4  ;;  %s166_s8 = int_to_ptr.vmem [resolvable:$true] %s165_s8 }
  0x11   :  { %85 = vmatpush.msra.mxu0 %v57_v2  ;;  %184 = vmatpush.msra.mxu1 %v57_v2 }
  0x13   :  { %86 = vmatpush.msra.mxu0 %v56_v3  ;;  %185 = vmatpush.msra.mxu1 %v56_v3 }
  0x14   :  { %178 = vmatmul.msk.f32.vlgmr.msra.gmra.mxu0 %vm64_vm0, %v54_v4  ;;  %179 = vmatmul.msk.f32.vlgmr.msra.gmra.mxu1 %vm64_vm0, %v55_v5 }
  0x91   :  { %v88_v7 = vpop.f32.mrf.mxu0  ;;  %v91_v8 = vpop.f32.mrf.mxu1 }
  0x92   :  { %v89_v9 = vadd.f32 %v191_v6, %v88_v7  ;;  %v92_v10 = vadd.f32 %v191_v6, %v91_v8 }
  0x94   :  { %v180_v11 = vmul.f32 -1.442695, %v89_v9  ;;  %v181_v12 = vmul.f32 -1.442695, %v92_v10 }
  0x96   :  { %193 = vpow2.f32 %v180_v11 }
  0x97   :  { %195 = vpow2.f32 %v181_v12 }
  0x9c   :  { %v194_v13 = vpop.eup %193 }
  0x9d   :  { %v196_v14 = vpop.eup %195  ;;  %v100_v15 = vadd.f32 1.0, %v194_v13 }
  0x9e   :  { %v101_v16 = vadd.f32 1.0, %v196_v14 }
  0x9f   :  { %197 = vrcp.f32 %v100_v15  ;;  %v113_v23 = vand.u32 2147483648, %v100_v15  ;;  %v111_v25 = vand.u32 2147483647, %v100_v15  ;;  %vm107_vm4 = vweird.f32 %v100_v15 }
  0xa0   :  { %199 = vrcp.f32 %v101_v16  ;;  %vm122_vm2 = vweird.f32 %v101_v16  ;;  %v128_v29 = vand.u32 2147483648, %v101_v16  ;;  %v126_v31 = vand.u32 2147483647, %v101_v16 }
  0xa1   :  { %v114_v30 = vor.u32 1.1754944e-38, %v113_v23  ;;  %vm112_vm6 = vcmp.eq.f32.partialorder %v111_v25, 8.507059e+37 }
  0xa2   :  { %v129_v37 = vor.u32 1.1754944e-38, %v128_v29  ;;  %vm127_vm8 = vcmp.eq.f32.partialorder %v126_v31, 8.507059e+37 }
  0xa5   :  { %v198_v17 = vpop.eup %197 }
  0xa6   :  { %v200_v18 = vpop.eup %199  ;;  %v103_v19 = vmul.f32 %v198_v17, %v100_v15  ;;  %vm108_vm1 = vweird.f32 %v198_v17 }
  0xa7   :  { %v118_v20 = vmul.f32 %v200_v18, %v101_v16  ;;  %vm123_vm3 = vweird.f32 %v200_v18  ;;  %vm109_vm5 = vmor %vm107_vm4, %vm108_vm1 }
  0xa8   :  { %v104_v21 = vsub.f32 1.0, %v103_v19  ;;  %vm124_vm7 = vmor %vm122_vm2, %vm123_vm3 }
  0xa9   :  { %v119_v22 = vsub.f32 1.0, %v118_v20 }
  0xaa   :  { %v105_v24 = vmul.f32 %v198_v17, %v104_v21 }
  0xab   :  { %v120_v26 = vmul.f32 %v200_v18, %v119_v22 }
  0xac   :  { %v106_v27 = vadd.f32 %v198_v17, %v105_v24 }
  0xad   :  { %v121_v28 = vadd.f32 %v200_v18, %v120_v26 }
  0xae   :  { %v110_v32 = vsel %vm109_vm5, %v198_v17, %v106_v27 }
  0xaf   :  { %v115_v34 = vsel %vm112_vm6, %v114_v30, %v110_v32  ;;  %v125_v35 = vsel %vm124_vm7, %v200_v18, %v121_v28 }
  0xb0   :  { %v132_v36 = vmul.f32 %v115_v34, %v89_v9  ;;  %v130_v39 = vsel %vm127_vm8, %v129_v37, %v125_v35 }
  0xb1   :  { %v133_v40 = vmul.f32 %v130_v39, %v92_v10 }
  0xb2   :  { %v138_v38 = vmul.f32 %v192_v33, %v132_v36 }
  0xb3   :  { %v139_v41 = vmul.f32 %v192_v33, %v133_v40 }
  0xb4   :  { %140 = vadd.xlane.f32.xlu0 %v138_v38 }
  0xbc   :  { %142 = vadd.xlane.f32.xlu0 %v139_v41 }
 0x127   :  { %v141_v42 = vpop.xlane.xlu0 %140 }
 0x128   :  { %v146_v46 = vadd.f32 %v145_v44, %v141_v42 }
 0x12a   :  { %v152_v50 = vperm.slane %v146_v46, %v151_v45 }
 0x12f   :  { %v143_v48 = vpop.xlane.xlu0 %142 }
 0x130   :  { %v147_v49 = vadd.f32 %v145_v44, %v143_v48 }
 0x132   :  { %v154_v51 = vperm.slane %v147_v49, %v153_v47 }
 0x134   :  { %v156_v52 = vsel %vm155_vm9, %v154_v51, %v152_v50 }
 0x135   :  { %159 = vst.msk [vmem:[#allocation8] sm:$0x1] %vm158_vm10, %v156_v52 }
 0x136   :  { %170 = dma.vmem_to_hbm [thread:$0]  %s166_s8, 16, %s168_s11, [#allocation5]  }
 0x137   :  { %277 = dma.done.wait [#allocation5], 16  }
 0x138   :  { %278 = vsyncadd [#allocation5], 4294967280 }
 0x139   :  { %175 = vsyncpa [#allocation4], 1 }
 0x13a   :  { %176 = vsyncpa [#allocation7], 1 }
 0x13b   :  { %177 = vsyncpa [#allocation5], 1 }

</bundles_post_ra>
